<compile_context>
chip_gen: v6e
topology: v6e:2x2x1
jax: 0.10.0
libtpu: 0.0.40
codegen_flags: <defaults>
</compile_context>

<pallas_src>
import functools

import jax
import jax.numpy as jnp
from jax.experimental import pallas as pl
from jax.experimental.pallas import tpu as pltpu

LANES = 128
SUBLANES = 8


def _cdiv(a, b):
    return (a + b - 1) // b


def _chip_config():
    """(n_core_split, default_tile_rows, vmem_limit_bytes) for the local TPU."""
    kind = ""
    try:
        kind = jax.devices()[0].device_kind.lower()
    except Exception:
        pass
    if "v7" in kind:   # 2 TensorCores/chip, ~3.2 TB/s HBM, 64 MiB physical VMEM
        return 2, 4096, 32 * 1024 * 1024
    if "v6" in kind:   # single TC, 32 MiB default scoped VMEM
        return 1, 2048, 32 * 1024 * 1024
    if "v5" in kind:   # single TC presented, 16 MiB default scoped -> raise it
        return 1, 2048, 32 * 1024 * 1024
    return 1, 1024, 32 * 1024 * 1024   # unknown chip: conservative


def _vae_loss_kernel(recon_ref, x_ref, mu_ref, logvar_ref, out_ref, acc_ref,
                     *, full_rows, tail_cols, chunk_rows):
    c = pl.program_id(0)             # core-split axis (CORE_PARALLEL on v7x)
    i = pl.program_id(1)             # row-tile reduction axis ("arbitrary")
    n_inner = pl.num_programs(1)
    tile_rows = recon_ref.shape[0]
    n_chunks = tile_rows // chunk_rows

    # acc_ref is per-core scratch (with CORE_PARALLEL each TC owns its copy).
    @pl.when(i == 0)
    def _():
        acc_ref[...] = jnp.zeros_like(acc_ref)

    blk = c * n_inner + i                       # unclamped logical block id
    block_last_row = (blk + 1) * tile_rows      # exclusive

    def chunk_sq(g):
        r = recon_ref[pl.ds(g * chunk_rows, chunk_rows), :].astype(jnp.float32)
        t = x_ref[pl.ds(g * chunk_rows, chunk_rows), :].astype(jnp.float32)
        d = r - t
        return d * d

    # Fast path: every row of this tile is fully valid -> no masking work.
    @pl.when(block_last_row <= full_rows)
    def _():
        def body(g, carry):
            acc_ref[...] += chunk_sq(g)
            return carry
        jax.lax.fori_loop(0, n_chunks, body, 0, unroll=True)

    # Ragged / clamped tiles: element-granular mask (rows past the data and
    # the sub-128 lane tail of the final partial row contribute exactly 0).
    @pl.when(block_last_row > full_rows)
    def _():
        row_iota = jax.lax.broadcasted_iota(jnp.int32, (chunk_rows, LANES), 0)
        col_iota = jax.lax.broadcasted_iota(jnp.int32, (chunk_rows, LANES), 1)

        def body(g, carry):
            row_global = blk * tile_rows + g * chunk_rows + row_iota
            valid = (row_global < full_rows) | (
                (row_global == full_rows) & (col_iota < tail_cols))
            acc_ref[...] += jnp.where(valid, chunk_sq(g), 0.0)
            return carry
        jax.lax.fori_loop(0, n_chunks, body, 0, unroll=True)

    # Finalize: one cross-lane reduce + KL term (KL added on core 0 only).
    @pl.when(i == n_inner - 1)
    def _():
        partial = jnp.sum(acc_ref[...])
        mu = mu_ref[...].astype(jnp.float32)
        lv = logvar_ref[...].astype(jnp.float32)
        # zero-padded latent entries contribute 1 + 0 - 0 - exp(0) = 0
        kld = -0.5 * jnp.sum(1.0 + lv - mu * mu - jnp.exp(lv))
        out_ref[0, 0] = partial + jnp.where(c == 0, kld, jnp.float32(0.0))


def _as_lane_dense(a, row_multiple=1):
    """Flatten and (only if needed) zero-pad to an (rows, 128) slab."""
    flat = a.reshape(-1)
    n = flat.shape[0]
    chunk = row_multiple * LANES
    n_pad = _cdiv(n, chunk) * chunk
    if n_pad != n:
        # TODO(synk): for lane-ragged numel this pad is a full HBM copy; the
        # kernel's masking is already element-granular, the pad exists only to
        # make the (rows, 128) reshape legal.
        flat = jnp.pad(flat, (0, n_pad - n))
    return flat.reshape(-1, LANES)


def vae_loss(recon_x, x, mu, logvar, *, tile_rows=None):
    """MSELoss(sum)(recon_x, x) - 0.5 * sum(1 + logvar - mu^2 - exp(logvar))."""
    assert recon_x.shape == x.shape
    n_split, default_tile_rows, vmem_limit = _chip_config()
    if tile_rows is None:
        tile_rows = default_tile_rows

    numel = 1
    for d in recon_x.shape:
        numel *= d
    full_rows = numel // LANES      # rows whose 128 lanes are all valid data
    tail_cols = numel % LANES       # valid lanes in the final partial row

    # Keep native dtype; f32 cast happens per-chunk inside the kernel.
    recon2d = _as_lane_dense(recon_x)           # (rows, 128)
    x2d = _as_lane_dense(x)
    rows = recon2d.shape[0]

    # mu / logvar are tiny: one lane-dense resident block each.
    mu2d = _as_lane_dense(mu, row_multiple=SUBLANES)
    lv2d = _as_lane_dense(logvar, row_multiple=SUBLANES)

    # Row-tile / chunk selection: chunks bound vreg live-ranges within a tile.
    rows_up = _cdiv(rows, SUBLANES) * SUBLANES
    if rows_up <= 128:
        tile_rows = rows_up
        chunk_rows = rows_up
    else:
        chunk_rows = 128
        tile_rows = max(chunk_rows,
                        min((tile_rows // chunk_rows) * chunk_rows,
                            _cdiv(rows_up, chunk_rows) * chunk_rows))

    num_row_blocks = _cdiv(rows, tile_rows)
    inner = _cdiv(num_row_blocks, n_split)

    def row_block_map(c, i):
        # Grid steps past the real block count re-read a valid block; they are
        # fully masked inside the kernel (blk is computed unclamped there).
        return (jnp.minimum(c * inner + i, num_row_blocks - 1), 0)

    kernel = functools.partial(_vae_loss_kernel, full_rows=full_rows,
                               tail_cols=tail_cols, chunk_rows=chunk_rows)

    itemsize = jnp.dtype(recon_x.dtype).itemsize
    lat_bytes = (mu2d.size + lv2d.size) * jnp.dtype(mu.dtype).itemsize
    cost = pl.CostEstimate(
        flops=3 * numel + 5 * int(mu.size),
        transcendentals=int(mu.size),
        bytes_accessed=2 * numel * itemsize + lat_bytes + 8,
    )

    if n_split > 1:
        dim_sems = (getattr(pltpu, "CORE_PARALLEL", "parallel"),
                    getattr(pltpu, "ARBITRARY", "arbitrary"))
    else:
        dim_sems = ("parallel", "arbitrary")

    partials = pl.pallas_call(
        kernel,
        out_shape=jax.ShapeDtypeStruct((n_split, 1), jnp.float32),
        grid_spec=pltpu.PrefetchScalarGridSpec(
            num_scalar_prefetch=0,
            grid=(n_split, inner),
            in_specs=[
                pl.BlockSpec((tile_rows, LANES), row_block_map),
                pl.BlockSpec((tile_rows, LANES), row_block_map),
                # small latent tensors: full-array blocks, resident each step
                pl.BlockSpec(mu2d.shape, lambda c, i: (0, 0)),
                pl.BlockSpec(lv2d.shape, lambda c, i: (0, 0)),
            ],
            out_specs=pl.BlockSpec((1, 1), lambda c, i: (c, 0),
                                   memory_space=pltpu.SMEM),
            scratch_shapes=[pltpu.VMEM((chunk_rows, LANES), jnp.float32)],
        ),
        compiler_params=pltpu.CompilerParams(
            dimension_semantics=dim_sems,
            vmem_limit_bytes=vmem_limit),
        cost_estimate=cost,
    )(recon2d, x2d, mu2d, lv2d)
    return jnp.sum(partials)


if __name__ == "__main__":
    key = jax.random.PRNGKey(0)
    k1, k2, k3, k4 = jax.random.split(key, 4)

    B, C, H, W = 2, 4, 16, 16
    LATENT = 32

    recon_x = jax.random.normal(k1, (B, C, H, W), dtype=jnp.float32)
    x = jax.random.normal(k2, (B, C, H, W), dtype=jnp.float32)
    mu = jax.random.normal(k3, (B, LATENT), dtype=jnp.float32)
    logvar = 0.1 * jax.random.normal(k4, (B, LATENT), dtype=jnp.float32)

    loss = vae_loss(recon_x, x, mu, logvar)
    jax.block_until_ready(loss)

    # pure-JAX reference for sanity
    mse_ref = jnp.sum((recon_x - x) ** 2)
    kld_ref = -0.5 * jnp.sum(1.0 + logvar - mu ** 2 - jnp.exp(logvar))
    ref = mse_ref + kld_ref
    assert jnp.allclose(loss, ref, rtol=1e-5, atol=1e-4), (loss, ref)

    print("KERNEL_OK")
</pallas_src>

<mosaic_0001>
module attributes {stable_mosaic.version = 11 : i64} {
  func.func @_vae_loss_kernel(%arg0: i32, %arg1: i32, %arg2: memref<16x128xf32, #tpu.memory_space<vmem>>, %arg3: memref<16x128xf32, #tpu.memory_space<vmem>>, %arg4: memref<8x128xf32, #tpu.memory_space<vmem>>, %arg5: memref<8x128xf32, #tpu.memory_space<vmem>>, %arg6: memref<1x1xf32, #tpu.memory_space<smem>>, %arg7: memref<16x128xf32, #tpu.memory_space<vmem>>) attributes {dimension_semantics = [#tpu.dimension_semantics<parallel>, #tpu.dimension_semantics<arbitrary>], iteration_bounds = array<i64: 1, 1>, scalar_prefetch = 0 : i64, scratch_operands = 1 : i64, tpu.core_type = #tpu.core_type<tc>, window_params = [{transform_indices = @transform_0, window_bounds = array<i64: 16, 128>}, {transform_indices = @transform_1, window_bounds = array<i64: 16, 128>}, {pipeline_mode = #tpu.pipeline_mode<synchronous>, transform_indices = @transform_2, window_bounds = array<i64: 8, 128>}, {pipeline_mode = #tpu.pipeline_mode<synchronous>, transform_indices = @transform_3, window_bounds = array<i64: 8, 128>}, {transform_indices = @transform_4, window_bounds = array<i64: 1, 1>}]} {
    %c0_i32 = arith.constant 0 : i32
    %0 = arith.cmpi eq, %arg1, %c0_i32 : i32
    %1 = arith.extui %0 : i1 to i32
    %c0_i32_0 = arith.constant 0 : i32
    %2 = arith.cmpi ne, %1, %c0_i32_0 : i32
    scf.if %2 {
      %cst = arith.constant 0.000000e+00 : f32
      %16 = vector.broadcast %cst : f32 to vector<16x128xf32>
      %c0 = arith.constant 0 : index
      %c0_8 = arith.constant 0 : index
      %17 = vector.load %arg7[%c0, %c0_8] : memref<16x128xf32, #tpu.memory_space<vmem>>, vector<16x128xf32>
      tpu.vector_store %arg7[%c0, %c0_8], %16 {strides = array<i32>} : memref<16x128xf32, #tpu.memory_space<vmem>>, vector<16x128xf32>,
    } else {
    }
    %c1_i32 = arith.constant 1 : i32
    %3 = arith.muli %arg0, %c1_i32 : i32
    %4 = arith.addi %3, %arg1 : i32
    %c1_i32_1 = arith.constant 1 : i32
    %5 = arith.addi %4, %c1_i32_1 : i32
    %c16_i32 = arith.constant 16 : i32
    %6 = arith.muli %5, %c16_i32 : i32
    %c16_i32_2 = arith.constant 16 : i32
    %7 = arith.cmpi sle, %6, %c16_i32_2 : i32
    %8 = arith.extui %7 : i1 to i32
    %c0_i32_3 = arith.constant 0 : i32
    %9 = arith.cmpi ne, %8, %c0_i32_3 : i32
    scf.if %9 {
      %c0_i32_8 = arith.constant 0 : i32
      %c0 = arith.constant 0 : index
      %c0_9 = arith.constant 0 : index
      %16 = vector.load %arg7[%c0, %c0_9] : memref<16x128xf32, #tpu.memory_space<vmem>>, vector<16x128xf32>
      %c16_i32_10 = arith.constant 16 : i32
      %17 = arith.muli %c0_i32_8, %c16_i32_10 : i32
      %18 = arith.index_cast %17 : i32 to index
      %c0_11 = arith.constant 0 : index
      %19 = vector.load %arg2[%18, %c0_11] : memref<16x128xf32, #tpu.memory_space<vmem>>, vector<16x128xf32>
      %c16_i32_12 = arith.constant 16 : i32
      %20 = arith.muli %c0_i32_8, %c16_i32_12 : i32
      %21 = arith.index_cast %20 : i32 to index
      %c0_13 = arith.constant 0 : index
      %22 = vector.load %arg3[%21, %c0_13] : memref<16x128xf32, #tpu.memory_space<vmem>>, vector<16x128xf32>
      %23 = arith.subf %19, %22 : vector<16x128xf32>
      %24 = arith.mulf %23, %23 : vector<16x128xf32>
      %25 = arith.addf %16, %24 : vector<16x128xf32>
      %c0_14 = arith.constant 0 : index
      %c0_15 = arith.constant 0 : index
      %26 = vector.load %arg7[%c0_14, %c0_15] : memref<16x128xf32, #tpu.memory_space<vmem>>, vector<16x128xf32>
      tpu.vector_store %arg7[%c0_14, %c0_15], %25 {strides = array<i32>} : memref<16x128xf32, #tpu.memory_space<vmem>>, vector<16x128xf32>,
      %c1_i32_16 = arith.constant 1 : i32
    } else {
    }
    %c16_i32_4 = arith.constant 16 : i32
    %10 = arith.cmpi sgt, %6, %c16_i32_4 : i32
    %11 = arith.extui %10 : i1 to i32
    %c0_i32_5 = arith.constant 0 : i32
    %12 = arith.cmpi ne, %11, %c0_i32_5 : i32
    scf.if %12 {
      %16 = tpu.iota {dimensions = array<i32: 0>} : vector<16x128xi32>
      %17 = tpu.iota {dimensions = array<i32: 1>} : vector<16x128xi32>
      %c0_i32_8 = arith.constant 0 : i32
      %c16_i32_9 = arith.constant 16 : i32
      %18 = arith.muli %4, %c16_i32_9 : i32
      %c16_i32_10 = arith.constant 16 : i32
      %19 = arith.muli %c0_i32_8, %c16_i32_10 : i32
      %20 = arith.addi %18, %19 : i32
      %21 = vector.broadcast %20 : i32 to vector<16x128xi32>
      %22 = arith.addi %21, %16 : vector<16x128xi32>
      %c16_i32_11 = arith.constant 16 : i32
      %23 = vector.broadcast %c16_i32_11 : i32 to vector<16x128xi32>
      %24 = arith.cmpi slt, %22, %23 : vector<16x128xi32>
      %c16_i32_12 = arith.constant 16 : i32
      %25 = vector.broadcast %c16_i32_12 : i32 to vector<16x128xi32>
      %26 = arith.cmpi eq, %22, %25 : vector<16x128xi32>
      %c0_i32_13 = arith.constant 0 : i32
      %27 = vector.broadcast %c0_i32_13 : i32 to vector<16x128xi32>
      %28 = arith.cmpi slt, %17, %27 : vector<16x128xi32>
      %29 = arith.andi %26, %28 : vector<16x128xi1>
      %30 = arith.ori %24, %29 : vector<16x128xi1>
      %c0 = arith.constant 0 : index
      %c0_14 = arith.constant 0 : index
      %31 = vector.load %arg7[%c0, %c0_14] : memref<16x128xf32, #tpu.memory_space<vmem>>, vector<16x128xf32>
      %c16_i32_15 = arith.constant 16 : i32
      %32 = arith.muli %c0_i32_8, %c16_i32_15 : i32
      %33 = arith.index_cast %32 : i32 to index
      %c0_16 = arith.constant 0 : index
      %34 = vector.load %arg2[%33, %c0_16] : memref<16x128xf32, #tpu.memory_space<vmem>>, vector<16x128xf32>
      %c16_i32_17 = arith.constant 16 : i32
      %35 = arith.muli %c0_i32_8, %c16_i32_17 : i32
      %36 = arith.index_cast %35 : i32 to index
      %c0_18 = arith.constant 0 : index
      %37 = vector.load %arg3[%36, %c0_18] : memref<16x128xf32, #tpu.memory_space<vmem>>, vector<16x128xf32>
      %38 = arith.subf %34, %37 : vector<16x128xf32>
      %39 = arith.mulf %38, %38 : vector<16x128xf32>
      %cst = arith.constant 0.000000e+00 : f32
      %40 = vector.broadcast %cst : f32 to vector<16x128xf32>
      %41 = arith.select %30, %39, %40 : vector<16x128xi1>, vector<16x128xf32>
      %42 = arith.addf %31, %41 : vector<16x128xf32>
      %c0_19 = arith.constant 0 : index
      %c0_20 = arith.constant 0 : index
      %43 = vector.load %arg7[%c0_19, %c0_20] : memref<16x128xf32, #tpu.memory_space<vmem>>, vector<16x128xf32>
      tpu.vector_store %arg7[%c0_19, %c0_20], %42 {strides = array<i32>} : memref<16x128xf32, #tpu.memory_space<vmem>>, vector<16x128xf32>,
      %c1_i32_21 = arith.constant 1 : i32
    } else {
    }
    %c0_i32_6 = arith.constant 0 : i32
    %13 = arith.cmpi eq, %arg1, %c0_i32_6 : i32
    %14 = arith.extui %13 : i1 to i32
    %c0_i32_7 = arith.constant 0 : i32
    %15 = arith.cmpi ne, %14, %c0_i32_7 : i32
    scf.if %15 {
      %c0 = arith.constant 0 : index
      %c0_8 = arith.constant 0 : index
      %16 = vector.load %arg7[%c0, %c0_8] : memref<16x128xf32, #tpu.memory_space<vmem>>, vector<16x128xf32>
      %17 = vector.shape_cast %16 : vector<16x128xf32> to vector<1x16x128xf32>
      %cst = arith.constant dense<0.000000e+00> : vector<1xf32>
      %18 = vector.multi_reduction <add>, %17, %cst [1, 2] : vector<1x16x128xf32> to vector<1xf32>
      %19 = vector.shape_cast %18 : vector<1xf32> to vector<1x1x1xf32>
      %20 = vector.extract %19[0, 0, 0] : f32 from vector<1x1x1xf32>
      %c0_9 = arith.constant 0 : index
      %c0_10 = arith.constant 0 : index
      %21 = vector.load %arg4[%c0_9, %c0_10] : memref<8x128xf32, #tpu.memory_space<vmem>>, vector<8x128xf32>
      %c0_11 = arith.constant 0 : index
      %c0_12 = arith.constant 0 : index
      %22 = vector.load %arg5[%c0_11, %c0_12] : memref<8x128xf32, #tpu.memory_space<vmem>>, vector<8x128xf32>
      %cst_13 = arith.constant 1.000000e+00 : f32
      %23 = vector.broadcast %cst_13 : f32 to vector<8x128xf32>
      %24 = arith.addf %23, %22 : vector<8x128xf32>
      %25 = arith.mulf %21, %21 : vector<8x128xf32>
      %26 = arith.subf %24, %25 : vector<8x128xf32>
      %27 = math.exp %22 : vector<8x128xf32>
      %28 = arith.subf %26, %27 : vector<8x128xf32>
      %29 = vector.shape_cast %28 : vector<8x128xf32> to vector<1x8x128xf32>
      %cst_14 = arith.constant dense<0.000000e+00> : vector<1xf32>
      %30 = vector.multi_reduction <add>, %29, %cst_14 [1, 2] : vector<1x8x128xf32> to vector<1xf32>
      %31 = vector.shape_cast %30 : vector<1xf32> to vector<1x1x1xf32>
      %32 = vector.extract %31[0, 0, 0] : f32 from vector<1x1x1xf32>
      %cst_15 = arith.constant -5.000000e-01 : f32
      %33 = arith.mulf %cst_15, %32 : f32
      %c0_i32_16 = arith.constant 0 : i32
      %34 = arith.cmpi eq, %arg0, %c0_i32_16 : i32
      %cst_17 = arith.constant 0.000000e+00 : f32
      %35 = arith.select %34, %33, %cst_17 : f32
      %36 = arith.addf %20, %35 : f32
      %c0_18 = arith.constant 0 : index
      %c0_19 = arith.constant 0 : index
      %37 = memref.load %arg6[%c0_18, %c0_19] : memref<1x1xf32, #tpu.memory_space<smem>>
      memref.store %36, %arg6[%c0_18, %c0_19] : memref<1x1xf32, #tpu.memory_space<smem>>
    } else {
    }
    return
  }
  func.func @transform_0(%arg0: i32, %arg1: i32) -> (i32, i32) {
    %c1_i32 = arith.constant 1 : i32
    %0 = arith.muli %arg0, %c1_i32 : i32
    %1 = arith.addi %0, %arg1 : i32
    %c0_i32 = arith.constant 0 : i32
    %2 = arith.minsi %1, %c0_i32 : i32
    %c0_i32_0 = arith.constant 0 : i32
    %c0_i32_1 = arith.constant 0 : i32
    return %2, %c0_i32_0 : i32, i32
  }
  func.func @transform_1(%arg0: i32, %arg1: i32) -> (i32, i32) {
    %c1_i32 = arith.constant 1 : i32
    %0 = arith.muli %arg0, %c1_i32 : i32
    %1 = arith.addi %0, %arg1 : i32
    %c0_i32 = arith.constant 0 : i32
    %2 = arith.minsi %1, %c0_i32 : i32
    %c0_i32_0 = arith.constant 0 : i32
    %c0_i32_1 = arith.constant 0 : i32
    return %2, %c0_i32_0 : i32, i32
  }
  func.func @transform_2(%arg0: i32, %arg1: i32) -> (i32, i32) {
    %c0_i32 = arith.constant 0 : i32
    %c0_i32_0 = arith.constant 0 : i32
    %c0_i32_1 = arith.constant 0 : i32
    return %c0_i32, %c0_i32_0 : i32, i32
  }
  func.func @transform_3(%arg0: i32, %arg1: i32) -> (i32, i32) {
    %c0_i32 = arith.constant 0 : i32
    %c0_i32_0 = arith.constant 0 : i32
    %c0_i32_1 = arith.constant 0 : i32
    return %c0_i32, %c0_i32_0 : i32, i32
  }
  func.func @transform_4(%arg0: i32, %arg1: i32) -> (i32, i32) {
    %c0_i32 = arith.constant 0 : i32
    %c0_i32_0 = arith.constant 0 : i32
    return %arg0, %c0_i32 : i32, i32
  }
}

</mosaic_0001>

<bundles_post_ra>
// kernel: tpu_custom_call.1
= control target key start
LH: loop header
LB: loop body
LE: loop exit
PB: predicated region body
PF: predicated region fallthrough
CT: control target
= control target key end

     0   :  { %9 = vsyncpa [#allocation4], 0  ;;  %s368_s0 = inlined_call_operand.hbm [shape: f32[16,128], index: 0, kind: input, shape index: {}]   ;;  %s369_s1 = inlined_call_operand.hbm [shape: f32[16,128], index: 1, kind: input, shape index: {}]   ;;  %s370_s2 = inlined_call_operand.hbm [shape: f32[8,128], index: 2, kind: input, shape index: {}]   ;;  %s371_s3 = inlined_call_operand.hbm [shape: f32[8,128], index: 3, kind: input, shape index: {}]   ;;  %s372_s4 = inlined_call_operand.hbm [shape: f32[1,1], index: 4, kind: output, shape index: {}]  }
   0x1   :  { %10 = vsyncpa [#allocation7], 0 }
   0x2   :  { %11 = vsyncpa [#allocation10], 0 }
   0x3   :  { %12 = vsyncpa [#allocation5], 0  ;;  %s321_s15 = smov [#allocation6]   ;;  %s322_s17 = smov [#allocation3]  }
   0x4   :  { %s42_s16 = sshll.u32 %s321_s15, 4  ;;  %s24_s18 = sshll.u32 %s322_s17, 4  ;;  %s43_s16 = int_to_ptr.vmem [resolvable:$true] %s42_s16  ;;  %s25_s18 = int_to_ptr.vmem [resolvable:$true] %s24_s18 }
   0x5   :  { %s233_s19 = scalar_lea.vmem %s43_s16, 256  ;;  %p238_p1 = scmp.lt.s32.totalorder %s43_s16, %s43_s16 }
   0x6   :  { %p234_p0 = scmp.ne.s32.totalorder %s43_s16, %s233_s19  ;;  %p239_p2 = scmp.lt.s32.totalorder %s233_s19, %s233_s19 }
   0x8   :  { %p240_p3 = por %p239_p2, %p238_p1 }
   0xa   :  { %p241_p4 = pnand %p240_p3, %p234_p0 }
   0xc   :  { %244 = shalt.err (!%p241_p4)
}
   0xd   :  { %s323_s20 = smov 128   ;;  %s324_s21 = smov 8  }
   0xe   :  { %48 = dma.hbm_to_vmem [thread:$0]  %s369_s1, 256, %s43_s16, [#allocation7], %s323_s20, %s323_s20, %s324_s21  }
   0xf   :  { %s253_s24 = scalar_lea.vmem %s25_s18, 256  ;;  %p258_p6 = scmp.lt.s32.totalorder %s25_s18, %s25_s18 }
  0x10   :  { %p254_p5 = scmp.ne.s32.totalorder %s25_s18, %s253_s24  ;;  %p259_p7 = scmp.lt.s32.totalorder %s253_s24, %s253_s24 }
  0x12   :  { %p260_p8 = por %p259_p7, %p258_p6 }
  0x14   :  { %p261_p9 = pnand %p260_p8, %p254_p5 }
  0x16   :  { %264 = shalt.err (!%p261_p9)
}
  0x17   :  { %30 = dma.hbm_to_vmem [thread:$0]  %s368_s0, 256, %s25_s18, [#allocation4], %s323_s20, %s323_s20, %s324_s21  }
  0x18   :  { %s325_s27 = smov [#allocation8]   ;;  %s326_s29 = smov [#allocation9]  }
  0x19   :  { %s55_s28 = sshll.u32 %s325_s27, 4  ;;  %s65_s30 = sshll.u32 %s326_s29, 4  ;;  %s56_s28 = int_to_ptr.vmem [resolvable:$true] %s55_s28  ;;  %s66_s30 = int_to_ptr.vmem [resolvable:$true] %s65_s30 }
  0x1a   :  { %s273_s5 = scalar_lea.vmem %s56_s28, 128  ;;  %p278_p11 = scmp.lt.s32.totalorder %s56_s28, %s56_s28 }
  0x1b   :  { %p274_p10 = scmp.ne.s32.totalorder %s56_s28, %s273_s5  ;;  %p279_p12 = scmp.lt.s32.totalorder %s273_s5, %s273_s5 }
  0x1d   :  { %p280_p13 = por %p279_p12, %p278_p11 }
  0x1f   :  { %p281_p0 = pnand %p280_p13, %p274_p10 }
  0x21   :  { %284 = shalt.err (!%p281_p0)
}
  0x22   :  { %58 = dma.hbm_to_vmem [thread:$0]  %s370_s2, 128, %s56_s28, [#allocation7]  }
  0x23   :  { %s293_s7 = scalar_lea.vmem %s66_s30, 128  ;;  %p298_p2 = scmp.lt.s32.totalorder %s66_s30, %s66_s30 }
  0x24   :  { %p294_p1 = scmp.ne.s32.totalorder %s66_s30, %s293_s7  ;;  %p299_p3 = scmp.lt.s32.totalorder %s293_s7, %s293_s7 }
  0x26   :  { %p300_p4 = por %p299_p3, %p298_p2 }
  0x28   :  { %p301_p5 = pnand %p300_p4, %p294_p1 }
  0x2a   :  { %304 = shalt.err (!%p301_p5)
}
  0x2b   :  { %68 = dma.hbm_to_vmem [thread:$0]  %s371_s3, 128, %s66_s30, [#allocation10]  }
  0x2c   :  { %313 = dma.done.wait [#allocation4], 256  }
  0x2d   :  { %314 = vsyncadd [#allocation4], 4294967040 }
  0x2e   :  { %315 = dma.done.wait [#allocation7], 384  }
  0x2f   :  { %316 = vsyncadd [#allocation7], 4294966912 }
  0x30   :  { %317 = dma.done.wait [#allocation10], 128  }
  0x31   :  { %318 = vsyncadd [#allocation10], 4294967168  ;;  %v104_v0 = vld [vmem:[#allocation3] sm:$0xff]  ;;  %v105_v1 = vld [vmem:[#allocation3 + $0x8] sm:$0xff]  ;;  %s327_s11 = smov [#allocation11]  }
  0x32   :  { %v106_v2 = vld [vmem:[#allocation6] sm:$0xff]  ;;  %v107_v3 = vld [vmem:[#allocation6 + $0x8] sm:$0xff]  ;;  %v170_v5 = vld [vmem:[#allocation9] sm:$0xff] }
  0x33   :  { %v108_v4 = vsub.f32 %v104_v0, %v106_v2  ;;  %v109_v6 = vsub.f32 %v105_v1, %v107_v3  ;;  %v174_v7 = vmul.f32 1.442695, %v170_v5  ;;  %v169_v11 = vld [vmem:[#allocation8] sm:$0xff]  ;;  %v171_v12 = vadd.f32 1.0, %v170_v5 }
  0x34   :  { %v172_v13 = vmul.f32 %v169_v11, %v169_v11 }
  0x35   :  { %v110_v8 = vmul.f32 %v108_v4, %v108_v4  ;;  %v111_v9 = vmul.f32 %v109_v6, %v109_v6  ;;  %223 = vpow2.f32 %v174_v7 }
  0x36   :  { %v173_v14 = vsub.f32 %v171_v12, %v172_v13 }
  0x37   :  { %v159_v10 = vadd.f32 %v111_v9, %v110_v8 }
  0x39   :  { %160 = vadd.xlane.f32.xlu0 %v159_v10 }
  0x42   :  { %v224_v15 = vpop.eup %223 }
  0x43   :  { %v176_v16 = vsub.f32 %v173_v14, %v224_v15 }
  0x45   :  { %177 = vadd.xlane.f32.xlu0 %v176_v16 }
  0xc2   :  { %v161_v17 = vpop.xlane.xlu0 %160 }
  0xc3   :  { %v162_v18 = vrot.slane %v161_v17, 4 }
  0xc5   :  { %v163_v19 = vadd.f32 %v162_v18, %v161_v17 }
  0xc7   :  { %v164_v20 = vrot.slane %v163_v19, 2 }
  0xc9   :  { %v165_v21 = vadd.f32 %v164_v20, %v163_v19 }
  0xcb   :  { %v166_v22 = vrot.slane %v165_v21, 1 }
  0xcd   :  { %v167_v23 = vadd.f32 %v166_v22, %v165_v21 }
  0xce   :  { %v178_v24 = vpop.xlane.xlu0 %177 }
  0xcf   :  { %v179_v25 = vrot.slane %v178_v24, 4  ;;  %212 = vpush %v167_v23 }
  0xd1   :  { %v180_v26 = vadd.f32 %v179_v25, %v178_v24 }
  0xd3   :  { %v181_v27 = vrot.slane %v180_v26, 2 }
  0xd5   :  { %v182_v28 = vadd.f32 %v181_v27, %v180_v26 }
  0xd7   :  { %v183_v29 = vrot.slane %v182_v28, 1 }
  0xd9   :  { %v184_v30 = vadd.f32 %v183_v29, %v182_v28 }
  0xdb   :  { %214 = vpush %v184_v30 }
 0x100   :  { %s213_s2 = spop %212 }
 0x10c   :  { %s215_s3 = spop %214 }
 0x10d   :  { %s186_s9 = smul.f32 -0.5, %s215_s3 }
 0x10f   :  { %s189_s10 = sadd.f32 %s213_s2, %s186_s9 }
 0x111   :  { %191 = sst [smem:[#allocation11]] %s189_s10 }
 0x112   :  { %199 = dma.smem_to_hbm %s327_s11, 16, %s372_s4, [#allocation5]  }
 0x113   :  { %319 = dma.done.wait [#allocation5], 16  }
 0x114   :  { %320 = vsyncadd [#allocation5], 4294967280 }
 0x115   :  { %203 = sfence }
 0x116   :  { %204 = vsyncpa [#allocation4], 1 }
 0x117   :  { %205 = vsyncpa [#allocation7], 1 }
 0x118   :  { %206 = vsyncpa [#allocation10], 1 }
 0x119   :  { %207 = vsyncpa [#allocation5], 1 }

</bundles_post_ra>
